<compile_context>
chip_gen: v7x
topology: tpu7x:2x2x1
jax: 0.10.0
libtpu: 0.0.40
codegen_flags: <defaults>
</compile_context>

<pallas_src>
import functools

import jax
import jax.numpy as jnp
from jax import lax
from jax.experimental import pallas as pl
from jax.experimental.pallas import tpu as pltpu

_EPS = 1e-5
_TR_MAX = 1024                       # row-tile target (>=512 per HBM roofline)
_VMEM_LIMIT = 48 * 1024 * 1024       # explicit scoped-VMEM limit (v7x headroom)


def _round_up(x, m):
    return -(-x // m) * m


# ----------------------------------------------------------------------------
# Pallas kernels
# ----------------------------------------------------------------------------
def _conv_pool_stats_kernel(p_ref, w_ref, y_ref, mean_ref, inv_ref, *, n_total):
    """Fused conv-as-matmul + pre-BN 2x2 maxpool + BN batch statistics.

    p_ref:    (n_off*TR, K) bf16  im2col rows; pooling offsets stacked as
                                  TR-row blocks inside the tile.
    w_ref:    (K, C)        bf16  conv weight (bias omitted: cancels in BN).
    y_ref:    (TR, C)       f32   pooled, pre-BN conv output for this tile.
    mean_ref: (1, C)        f32   running sum  -> finalized to per-channel mean.
    inv_ref:  (1, C)        f32   running sum2 -> finalized to rsqrt(var + eps).
    """
    i = pl.program_id(0)
    tr = y_ref.shape[0]
    n_off = p_ref.shape[0] // tr

    # One sustained MXU push for all pooling offsets (weight loaded once).
    y_all = jnp.dot(p_ref[...], w_ref[...], preferred_element_type=jnp.float32)

    # Single-pass batch statistics (sum / sum-of-squares accumulators).
    @pl.when(i == 0)
    def _init():
        mean_ref[...] = jnp.zeros_like(mean_ref)
        inv_ref[...] = jnp.zeros_like(inv_ref)

    mean_ref[...] += jnp.sum(y_all, axis=0, keepdims=True)
    inv_ref[...] += jnp.sum(y_all * y_all, axis=0, keepdims=True)

    # 2x2 max-pool BEFORE BN (BN + ReLU are monotone per channel, so they
    # commute with the max); static, sublane-aligned row slices.
    m = y_all[0:tr]
    for o in range(1, n_off):
        m = jnp.maximum(m, y_all[o * tr:(o + 1) * tr])
    y_ref[...] = m

    # Finalize mean / inverse-std on the last tile (rsqrt -> EUP slot).
    @pl.when(i == pl.num_programs(0) - 1)
    def _finalize():
        mu = mean_ref[...] * (1.0 / n_total)
        var = jnp.maximum(inv_ref[...] * (1.0 / n_total) - mu * mu, 0.0)
        mean_ref[...] = mu
        inv_ref[...] = lax.rsqrt(var + _EPS)


def _bn_relu_kernel(y_ref, mean_ref, inv_ref, o_ref):
    """BatchNorm (no affine) normalize + ReLU; tiled, fully parallel rows."""
    o_ref[...] = jnp.maximum((y_ref[...] - mean_ref[...]) * inv_ref[...], 0.0)


# ----------------------------------------------------------------------------
# JAX glue: im2col construction + pallas_call wrappers
# ----------------------------------------------------------------------------
def _im2col_offset_mats(x_nhwc, pool):
    """Per-pooling-offset im2col matrices, each (R, 9*Cin) f32."""
    n, h, w, c = x_nhwc.shape
    xp = jnp.pad(x_nhwc, ((0, 0), (1, 1), (1, 1), (0, 0)))
    if pool:
        ho, wo = h // 2, w // 2
        offsets = [(a, b) for a in range(2) for b in range(2)]
    else:
        ho, wo = h, w
        offsets = [(0, 0)]
    mats = []
    for (a, b) in offsets:
        taps = []
        for ky in range(3):
            for kx in range(3):
                if pool:
                    sl = xp[:, a + ky::2, b + kx::2, :][:, :ho, :wo, :]
                else:
                    sl = xp[:, ky:ky + h, kx:kx + w, :]
                taps.append(sl)
        mats.append(jnp.stack(taps, axis=3).reshape(n * ho * wo, 9 * c))
    return mats, ho, wo


def conv_block(x_nhwc, w_hwio, *, pool):
    """One Conv32F block: (N,H,W,Cin) f32 -> (N,Ho,Wo,Cout) f32."""
    n, h, w, cin = x_nhwc.shape
    cout = w_hwio.shape[-1]
    if pool:
        assert h % 2 == 0 and w % 2 == 0, "pooled block needs even H, W"

    mats, ho, wo = _im2col_offset_mats(x_nhwc, pool)
    n_off = len(mats)
    r = n * ho * wo                      # output rows (pooled positions)
    k = 9 * cin
    k_pad = _round_up(k, 8)              # 27 -> 32 for block 1
    tr = min(_TR_MAX, _round_up(r, 8))
    r_pad = _round_up(r, tr)
    n_tiles = r_pad // tr

    # Group rows tile-major so each grid step reads one contiguous
    # (n_off*TR, K) slab: flat row = ((tile*n_off + offset)*TR + local_row).
    # Zero row/col padding is exact: it adds 0 to sum/sum-sq and the TRUE
    # element count (n_total) is used for the statistics.
    mats = [jnp.pad(m, ((0, r_pad - r), (0, k_pad - k))) for m in mats]
    grouped = jnp.stack(mats, axis=0).reshape(n_off, n_tiles, tr, k_pad)
    grouped = jnp.transpose(grouped, (1, 0, 2, 3))
    p_mat = grouped.reshape(n_tiles * n_off * tr, k_pad).astype(jnp.bfloat16)

    w_mat = jnp.pad(w_hwio.astype(jnp.float32).reshape(k, cout),
                    ((0, k_pad - k), (0, 0))).astype(jnp.bfloat16)

    n_total = n_off * r                  # true number of conv positions N*H*W

    y_pre, mean, inv = pl.pallas_call(
        functools.partial(_conv_pool_stats_kernel, n_total=float(n_total)),
        out_shape=(jax.ShapeDtypeStruct((r_pad, cout), jnp.float32),
                   jax.ShapeDtypeStruct((1, cout), jnp.float32),
                   jax.ShapeDtypeStruct((1, cout), jnp.float32)),
        grid=(n_tiles,),
        in_specs=[pl.BlockSpec((n_off * tr, k_pad), lambda i: (i, 0)),
                  pl.BlockSpec((k_pad, cout), lambda i: (0, 0))],
        out_specs=(pl.BlockSpec((tr, cout), lambda i: (i, 0)),
                   pl.BlockSpec((1, cout), lambda i: (0, 0)),
                   pl.BlockSpec((1, cout), lambda i: (0, 0))),
        compiler_params=pltpu.CompilerParams(
            dimension_semantics=("arbitrary",),      # resident stats accumulator
            vmem_limit_bytes=_VMEM_LIMIT),
        cost_estimate=pl.CostEstimate(
            flops=2 * n_off * r_pad * k_pad * cout,
            transcendentals=cout,
            bytes_accessed=(n_off * r_pad * k_pad + k_pad * cout) * 2
                           + (r_pad + 2) * cout * 4),
    )(p_mat, w_mat)

    out = pl.pallas_call(
        _bn_relu_kernel,
        out_shape=jax.ShapeDtypeStruct((r_pad, cout), jnp.float32),
        grid=(n_tiles,),
        in_specs=[pl.BlockSpec((tr, cout), lambda i: (i, 0)),
                  pl.BlockSpec((1, cout), lambda i: (0, 0)),
                  pl.BlockSpec((1, cout), lambda i: (0, 0))],
        out_specs=pl.BlockSpec((tr, cout), lambda i: (i, 0)),
        compiler_params=pltpu.CompilerParams(
            dimension_semantics=("parallel",),       # megacore-friendly
            vmem_limit_bytes=_VMEM_LIMIT),
        cost_estimate=pl.CostEstimate(
            flops=3 * r_pad * cout,
            transcendentals=0,
            bytes_accessed=2 * r_pad * cout * 4 + 2 * cout * 4),
    )(y_pre, mean, inv)

    return out[:r].reshape(n, ho, wo, cout)


# ----------------------------------------------------------------------------
# Model: parameter init + forward
# ----------------------------------------------------------------------------
def init_params(key):
    """Deterministic synthetic params. Conv weights stored HWIO (3,3,Cin,Cout)."""
    chans = [(3, 32), (32, 32), (32, 32), (32, 32)]
    params = []
    for i, (cin, cout) in enumerate(chans):
        kw, kb = jax.random.split(jax.random.fold_in(key, i))
        fan_in = 9 * cin
        wgt = jax.random.normal(kw, (3, 3, cin, cout), jnp.float32) * jnp.sqrt(
            2.0 / fan_in)
        b = jax.random.uniform(kb, (cout,), jnp.float32,
                               -1.0 / jnp.sqrt(fan_in), 1.0 / jnp.sqrt(fan_in))
        params.append((wgt, b))
    return params


def conv32f_no_affine_forward(x_nchw, params, *, is_flatten=False,
                              is_feature=False, last_pool=True):
    """Matches Conv32F_no_affine.forward (training-mode BN, ReLU activation)."""
    x = jnp.transpose(x_nchw, (0, 2, 3, 1)).astype(jnp.float32)  # NHWC
    outs = []
    for li, (wgt, _bias) in enumerate(params):
        pool = True if li < 3 else last_pool
        # Bias is mathematically redundant before no-affine batch-stat BN.
        x = conv_block(x, wgt, pool=pool)
        outs.append(jnp.transpose(x, (0, 3, 1, 2)))              # back to NCHW
    out4 = outs[-1]
    if is_flatten:
        out4 = out4.reshape(out4.shape[0], -1)
        outs[-1] = out4
    if is_feature:
        return tuple(outs)
    return out4


# ----------------------------------------------------------------------------
# Pure-JAX reference (bf16-matmul matched, WITH conv bias, standard BN order)
# ----------------------------------------------------------------------------
def _ref_block(x_nhwc, w_hwio, bias, *, pool):
    y = lax.conv_general_dilated(
        x_nhwc.astype(jnp.bfloat16), w_hwio.astype(jnp.bfloat16), (1, 1), "SAME",
        dimension_numbers=("NHWC", "HWIO", "NHWC"),
        preferred_element_type=jnp.float32) + bias
    mean = jnp.mean(y, axis=(0, 1, 2), keepdims=True)
    var = jnp.mean((y - mean) ** 2, axis=(0, 1, 2), keepdims=True)
    y = jnp.maximum((y - mean) * lax.rsqrt(var + _EPS), 0.0)
    if pool:
        n, h, w, c = y.shape
        y = y.reshape(n, h // 2, 2, w // 2, 2, c).max(axis=(2, 4))
    return y


def _ref_forward(x_nchw, params, *, last_pool=True):
    x = jnp.transpose(x_nchw, (0, 2, 3, 1)).astype(jnp.float32)
    for li, (wgt, b) in enumerate(params):
        x = _ref_block(x, wgt, b, pool=(True if li < 3 else last_pool))
    return jnp.transpose(x, (0, 3, 1, 2))


# ----------------------------------------------------------------------------
if __name__ == "__main__":
    key = jax.random.PRNGKey(0)
    k_x, k_p = jax.random.split(key)
    # Small input consistent with the module: NCHW, 3 input channels.
    x = jax.random.normal(k_x, (2, 3, 16, 16), jnp.float32)
    params = init_params(k_p)

    # Strict single-block check (no compounded bf16-requantization of
    # intermediates): verifies conv/pool/BN semantics incl. bias cancelation.
    x_nhwc = jnp.transpose(x, (0, 2, 3, 1))
    blk = jax.block_until_ready(conv_block(x_nhwc, params[0][0], pool=True))
    blk_ref = jax.block_until_ready(
        _ref_block(x_nhwc, params[0][0], params[0][1], pool=True))
    assert blk.shape == (2, 8, 8, 32), blk.shape
    err_blk = float(jnp.max(jnp.abs(blk - blk_ref)))
    assert err_blk < 1e-3, err_blk

    # Full forward (default config): 16 -> 8 -> 4 -> 2 -> 1.
    fwd = jax.jit(conv32f_no_affine_forward)
    out = jax.block_until_ready(fwd(x, params))
    assert out.shape == (2, 32, 1, 1), out.shape
    ref = jax.block_until_ready(jax.jit(_ref_forward)(x, params))
    err = float(jnp.max(jnp.abs(out - ref)))
    assert err < 1e-2, err  # loose: bf16 requantization of intermediates differs

    # Exercise the no-pool final block and feature path (last_pool=False).
    fwd_np = jax.jit(functools.partial(conv32f_no_affine_forward,
                                       is_feature=True, last_pool=False))
    feats = jax.block_until_ready(fwd_np(x, params))
    assert feats[-1].shape == (2, 32, 2, 2), feats[-1].shape
    ref_np = jax.block_until_ready(
        jax.jit(functools.partial(_ref_forward, last_pool=False))(x, params))
    err_np = float(jnp.max(jnp.abs(feats[-1] - ref_np)))
    assert err_np < 1e-2, err_np

    print("KERNEL_OK")
</pallas_src>

<mosaic_0001>
module attributes {stable_mosaic.version = 11 : i64} {
  func.func @_conv_pool_stats_kernel(%arg0: i32, %arg1: memref<512x32xbf16, #tpu.memory_space<vmem>>, %arg2: memref<32x32xbf16, #tpu.memory_space<vmem>>, %arg3: memref<128x32xf32, #tpu.memory_space<vmem>>, %arg4: memref<1x32xf32, #tpu.memory_space<vmem>>, %arg5: memref<1x32xf32, #tpu.memory_space<vmem>>) attributes {dimension_semantics = [#tpu.dimension_semantics<arbitrary>], iteration_bounds = array<i64: 1>, scalar_prefetch = 0 : i64, scratch_operands = 0 : i64, tpu.core_type = #tpu.core_type<tc>, window_params = [{transform_indices = @transform_0, window_bounds = array<i64: 512, 32>}, {pipeline_mode = #tpu.pipeline_mode<synchronous>, transform_indices = @transform_1, window_bounds = array<i64: 32, 32>}, {transform_indices = @transform_2, window_bounds = array<i64: 128, 32>}, {pipeline_mode = #tpu.pipeline_mode<synchronous>, transform_indices = @transform_3, window_bounds = array<i64: 1, 32>}, {pipeline_mode = #tpu.pipeline_mode<synchronous>, transform_indices = @transform_4, window_bounds = array<i64: 1, 32>}]} {
    %c0 = arith.constant 0 : index
    %c0_0 = arith.constant 0 : index
    %0 = vector.load %arg1[%c0, %c0_0] : memref<512x32xbf16, #tpu.memory_space<vmem>>, vector<512x32xbf16>
    %c0_1 = arith.constant 0 : index
    %c0_2 = arith.constant 0 : index
    %1 = vector.load %arg2[%c0_1, %c0_2] : memref<32x32xbf16, #tpu.memory_space<vmem>>, vector<32x32xbf16>
    %cst = arith.constant dense<0.000000e+00> : vector<512x32xf32>
    %2 = tpu.matmul %0, %1, %cst {dimension_numbers = #tpu.dot_dimension_numbers<[1], [0], [0], [1], [0, 0, 1, 1], [], []>} : vector<512x32xbf16>, vector<32x32xbf16>, vector<512x32xf32> -> vector<512x32xf32>
    %c0_i32 = arith.constant 0 : i32
    %3 = arith.cmpi eq, %arg0, %c0_i32 : i32
    %4 = arith.extui %3 : i1 to i32
    %c0_i32_3 = arith.constant 0 : i32
    %5 = arith.cmpi ne, %4, %c0_i32_3 : i32
    scf.if %5 {
      %cst_18 = arith.constant 0.000000e+00 : f32
      %28 = vector.broadcast %cst_18 : f32 to vector<1x32xf32>
      %c0_19 = arith.constant 0 : index
      %c0_20 = arith.constant 0 : index
      %29 = vector.load %arg4[%c0_19, %c0_20] : memref<1x32xf32, #tpu.memory_space<vmem>>, vector<1x32xf32>
      tpu.vector_store %arg4[%c0_19, %c0_20], %28 {strides = array<i32>} : memref<1x32xf32, #tpu.memory_space<vmem>>, vector<1x32xf32>,
      %cst_21 = arith.constant 0.000000e+00 : f32
      %30 = vector.broadcast %cst_21 : f32 to vector<1x32xf32>
      %c0_22 = arith.constant 0 : index
      %c0_23 = arith.constant 0 : index
      %31 = vector.load %arg5[%c0_22, %c0_23] : memref<1x32xf32, #tpu.memory_space<vmem>>, vector<1x32xf32>
      tpu.vector_store %arg5[%c0_22, %c0_23], %30 {strides = array<i32>} : memref<1x32xf32, #tpu.memory_space<vmem>>, vector<1x32xf32>,
    } else {
    }
    %c0_4 = arith.constant 0 : index
    %c0_5 = arith.constant 0 : index
    %6 = vector.load %arg4[%c0_4, %c0_5] : memref<1x32xf32, #tpu.memory_space<vmem>>, vector<1x32xf32>
    %cst_6 = arith.constant dense<0.000000e+00> : vector<32xf32>
    %7 = vector.multi_reduction <add>, %2, %cst_6 [0] : vector<512x32xf32> to vector<32xf32>
    %8 = vector.shape_cast %7 : vector<32xf32> to vector<1x32xf32>
    %9 = arith.addf %6, %8 : vector<1x32xf32>
    %c0_7 = arith.constant 0 : index
    %c0_8 = arith.constant 0 : index
    %10 = vector.load %arg4[%c0_7, %c0_8] : memref<1x32xf32, #tpu.memory_space<vmem>>, vector<1x32xf32>
    tpu.vector_store %arg4[%c0_7, %c0_8], %9 {strides = array<i32>} : memref<1x32xf32, #tpu.memory_space<vmem>>, vector<1x32xf32>,
    %c0_9 = arith.constant 0 : index
    %c0_10 = arith.constant 0 : index
    %11 = vector.load %arg5[%c0_9, %c0_10] : memref<1x32xf32, #tpu.memory_space<vmem>>, vector<1x32xf32>
    %12 = arith.mulf %2, %2 : vector<512x32xf32>
    %cst_11 = arith.constant dense<0.000000e+00> : vector<32xf32>
    %13 = vector.multi_reduction <add>, %12, %cst_11 [0] : vector<512x32xf32> to vector<32xf32>
    %14 = vector.shape_cast %13 : vector<32xf32> to vector<1x32xf32>
    %15 = arith.addf %11, %14 : vector<1x32xf32>
    %c0_12 = arith.constant 0 : index
    %c0_13 = arith.constant 0 : index
    %16 = vector.load %arg5[%c0_12, %c0_13] : memref<1x32xf32, #tpu.memory_space<vmem>>, vector<1x32xf32>
    tpu.vector_store %arg5[%c0_12, %c0_13], %15 {strides = array<i32>} : memref<1x32xf32, #tpu.memory_space<vmem>>, vector<1x32xf32>,
    %17 = vector.extract_strided_slice %2 {offsets = [0, 0], sizes = [128, 32], strides = [1, 1]} : vector<512x32xf32> to vector<128x32xf32>
    %18 = vector.extract_strided_slice %2 {offsets = [128, 0], sizes = [128, 32], strides = [1, 1]} : vector<512x32xf32> to vector<128x32xf32>
    %19 = arith.maximumf %17, %18 : vector<128x32xf32>
    %20 = vector.extract_strided_slice %2 {offsets = [256, 0], sizes = [128, 32], strides = [1, 1]} : vector<512x32xf32> to vector<128x32xf32>
    %21 = arith.maximumf %19, %20 : vector<128x32xf32>
    %22 = vector.extract_strided_slice %2 {offsets = [384, 0], sizes = [128, 32], strides = [1, 1]} : vector<512x32xf32> to vector<128x32xf32>
    %23 = arith.maximumf %21, %22 : vector<128x32xf32>
    %c0_14 = arith.constant 0 : index
    %c0_15 = arith.constant 0 : index
    %24 = vector.load %arg3[%c0_14, %c0_15] : memref<128x32xf32, #tpu.memory_space<vmem>>, vector<128x32xf32>
    tpu.vector_store %arg3[%c0_14, %c0_15], %23 {strides = array<i32>} : memref<128x32xf32, #tpu.memory_space<vmem>>, vector<128x32xf32>,
    %c0_i32_16 = arith.constant 0 : i32
    %25 = arith.cmpi eq, %arg0, %c0_i32_16 : i32
    %26 = arith.extui %25 : i1 to i32
    %c0_i32_17 = arith.constant 0 : i32
    %27 = arith.cmpi ne, %26, %c0_i32_17 : i32
    scf.if %27 {
      %c0_18 = arith.constant 0 : index
      %c0_19 = arith.constant 0 : index
      %28 = vector.load %arg4[%c0_18, %c0_19] : memref<1x32xf32, #tpu.memory_space<vmem>>, vector<1x32xf32>
      %cst_20 = arith.constant 0.001953125 : f32
      %29 = vector.broadcast %cst_20 : f32 to vector<1x32xf32>
      %30 = arith.mulf %28, %29 : vector<1x32xf32>
      %c0_21 = arith.constant 0 : index
      %c0_22 = arith.constant 0 : index
      %31 = vector.load %arg5[%c0_21, %c0_22] : memref<1x32xf32, #tpu.memory_space<vmem>>, vector<1x32xf32>
      %cst_23 = arith.constant 0.001953125 : f32
      %32 = vector.broadcast %cst_23 : f32 to vector<1x32xf32>
      %33 = arith.mulf %31, %32 : vector<1x32xf32>
      %34 = arith.mulf %30, %30 : vector<1x32xf32>
      %35 = arith.subf %33, %34 : vector<1x32xf32>
      %cst_24 = arith.constant 0.000000e+00 : f32
      %36 = vector.broadcast %cst_24 : f32 to vector<1x32xf32>
      %37 = arith.maximumf %35, %36 : vector<1x32xf32>
      %c0_25 = arith.constant 0 : index
      %c0_26 = arith.constant 0 : index
      %38 = vector.load %arg4[%c0_25, %c0_26] : memref<1x32xf32, #tpu.memory_space<vmem>>, vector<1x32xf32>
      tpu.vector_store %arg4[%c0_25, %c0_26], %30 {strides = array<i32>} : memref<1x32xf32, #tpu.memory_space<vmem>>, vector<1x32xf32>,
      %cst_27 = arith.constant 9.99999974E-6 : f32
      %39 = vector.broadcast %cst_27 : f32 to vector<1x32xf32>
      %40 = arith.addf %37, %39 : vector<1x32xf32>
      %41 = math.rsqrt %40 : vector<1x32xf32>
      %c0_28 = arith.constant 0 : index
      %c0_29 = arith.constant 0 : index
      %42 = vector.load %arg5[%c0_28, %c0_29] : memref<1x32xf32, #tpu.memory_space<vmem>>, vector<1x32xf32>
      tpu.vector_store %arg5[%c0_28, %c0_29], %41 {strides = array<i32>} : memref<1x32xf32, #tpu.memory_space<vmem>>, vector<1x32xf32>,
    } else {
    }
    return
  }
  func.func @transform_0(%arg0: i32) -> (i32, i32) {
    %c0_i32 = arith.constant 0 : i32
    %c0_i32_0 = arith.constant 0 : i32
    return %arg0, %c0_i32 : i32, i32
  }
  func.func @transform_1(%arg0: i32) -> (i32, i32) {
    %c0_i32 = arith.constant 0 : i32
    %c0_i32_0 = arith.constant 0 : i32
    %c0_i32_1 = arith.constant 0 : i32
    return %c0_i32, %c0_i32_0 : i32, i32
  }
  func.func @transform_2(%arg0: i32) -> (i32, i32) {
    %c0_i32 = arith.constant 0 : i32
    %c0_i32_0 = arith.constant 0 : i32
    return %arg0, %c0_i32 : i32, i32
  }
  func.func @transform_3(%arg0: i32) -> (i32, i32) {
    %c0_i32 = arith.constant 0 : i32
    %c0_i32_0 = arith.constant 0 : i32
    %c0_i32_1 = arith.constant 0 : i32
    return %c0_i32, %c0_i32_0 : i32, i32
  }
  func.func @transform_4(%arg0: i32) -> (i32, i32) {
    %c0_i32 = arith.constant 0 : i32
    %c0_i32_0 = arith.constant 0 : i32
    %c0_i32_1 = arith.constant 0 : i32
    return %c0_i32, %c0_i32_0 : i32, i32
  }
}

</mosaic_0001>

<bundles_post_ra>
// kernel: tpu_custom_call.1
= control target key start
LH: loop header
LB: loop body
LE: loop exit
PB: predicated region body
PF: predicated region fallthrough
CT: control target
= control target key end

     0   :  { %10 = vsyncpa [#allocation3], 0  ;;  %vm257_vm0 = vcmask 261120   ;;  %s2046_s0 = inlined_call_operand.vmem [shape: bf16[512,32], index: 0, kind: input, shape index: {}]   ;;  %s2047_s1 = inlined_call_operand.vmem [shape: bf16[32,32], index: 1, kind: input, shape index: {}]   ;;  %s2048_s2 = inlined_call_operand.vmem [shape: f32[128,32], index: 2, kind: output, shape index: {0}]   ;;  %s2049_s3 = inlined_call_operand.hbm [shape: f32[1,32], index: 3, kind: output, shape index: {1}]   ;;  %s2050_s4 = inlined_call_operand.hbm [shape: f32[1,32], index: 4, kind: output, shape index: {2}]  }
   0x1   :  { %v1272_v0 = vld [vmem:[%s2047_s1] sm:$0xff]   ;;  %v1273_v1 = vld [vmem:[%s2047_s1 + $0x8] sm:$0xff]   ;;  %v1278_v6 = vld [vmem:[%s2046_s0 + $0x10] sm:$0xff]  }
   0x2   :  { %1197 = vmatprep.subr.bf16.mxu0 %v1272_v0  ;;  %1265 = vmatprep.subr.bf16.mxu1 %v1272_v0  ;;  %v1274_v2 = vld [vmem:[%s2046_s0] sm:$0xff]   ;;  %v1275_v4 = vld [vmem:[%s2046_s0 + $0x8] sm:$0xff]   ;;  %v1280_v7 = vld [vmem:[%s2046_s0 + $0x90] sm:$0xff]  }
   0x3   :  { %1198 = vmatpush3.bf16.msra.mxu0 %v1272_v0  ;;  %1267 = vmatpush3.bf16.msra.mxu1 %v1272_v0  ;;  %v1276_v3 = vld [vmem:[%s2046_s0 + $0x80] sm:$0xff]   ;;  %v1277_v5 = vld [vmem:[%s2046_s0 + $0x88] sm:$0xff]   ;;  %v1279_v8 = vld [vmem:[%s2046_s0 + $0x18] sm:$0xff]  }
   0x4   :  { %1199 = vmatprep.subr.bf16.mxu0 %v1273_v1  ;;  %1201 = vmatprep.mubr.msk.bf16.mxu0 %vm257_vm0, %v1274_v2  ;;  %v1281_v9 = vld [vmem:[%s2046_s0 + $0x98] sm:$0xff]   ;;  %v1282_v10 = vld [vmem:[%s2046_s0 + $0x20] sm:$0xff]   ;;  %v1283_v12 = vld [vmem:[%s2046_s0 + $0x28] sm:$0xff]  }
   0x5   :  { %1266 = vmatprep.subr.bf16.mxu1 %v1273_v1  ;;  %1233 = vmatprep.mubr.msk.bf16.mxu1 %vm257_vm0, %v1276_v3  ;;  %v1284_v11 = vld [vmem:[%s2046_s0 + $0xa0] sm:$0xff]   ;;  %v1285_v13 = vld [vmem:[%s2046_s0 + $0xa8] sm:$0xff]   ;;  %v1286_v14 = vld [vmem:[%s2046_s0 + $0x30] sm:$0xff]  }
   0x6   :  { %v1288_v15 = vld [vmem:[%s2046_s0 + $0xb0] sm:$0xff]   ;;  %v1287_v16 = vld [vmem:[%s2046_s0 + $0x38] sm:$0xff]   ;;  %v1290_v18 = vld [vmem:[%s2046_s0 + $0x40] sm:$0xff]  }
   0x7   :  { %1200 = vmatpush3.bf16.msra.mxu0 %v1273_v1  ;;  %1268 = vmatpush3.bf16.msra.mxu1 %v1273_v1  ;;  %v1289_v17 = vld [vmem:[%s2046_s0 + $0xb8] sm:$0xff]   ;;  %v1292_v19 = vld [vmem:[%s2046_s0 + $0xc0] sm:$0xff]  }
   0xa   :  { %1202 = vmatmul.mubr.msk.bf16.vlgmr.msra.gmra.mrb[0].mxu0 %vm257_vm0, %v1275_v4  ;;  %1234 = vmatmul.mubr.msk.bf16.vlgmr.msra.gmra.mrb[0].mxu1 %vm257_vm0, %v1277_v5 }
   0xb   :  { %1205 = vmatprep.mubr.msk.bf16.mxu0 %vm257_vm0, %v1278_v6  ;;  %1237 = vmatprep.mubr.msk.bf16.mxu1 %vm257_vm0, %v1280_v7 }
  0x12   :  { %1206 = vmatmul.mubr.msk.bf16.gmra.mrb[4].mxu0 %vm257_vm0, %v1279_v8  ;;  %1238 = vmatmul.mubr.msk.bf16.gmra.mrb[4].mxu1 %vm257_vm0, %v1281_v9 }
  0x13   :  { %1209 = vmatprep.mubr.msk.bf16.mxu0 %vm257_vm0, %v1282_v10  ;;  %1241 = vmatprep.mubr.msk.bf16.mxu1 %vm257_vm0, %v1284_v11 }
  0x1a   :  { %1210 = vmatmul.mubr.msk.bf16.gmra.mrb[8].mxu0 %vm257_vm0, %v1283_v12  ;;  %1242 = vmatmul.mubr.msk.bf16.gmra.mrb[8].mxu1 %vm257_vm0, %v1285_v13 }
  0x1b   :  { %1213 = vmatprep.mubr.msk.bf16.mxu0 %vm257_vm0, %v1286_v14  ;;  %1245 = vmatprep.mubr.msk.bf16.mxu1 %vm257_vm0, %v1288_v15 }
  0x22   :  { %1214 = vmatmul.mubr.msk.bf16.gmra.mrb[12].mxu0 %vm257_vm0, %v1287_v16  ;;  %1246 = vmatmul.mubr.msk.bf16.gmra.mrb[12].mxu1 %vm257_vm0, %v1289_v17 }
  0x23   :  { %11 = vsyncpa [#allocation5], 0  ;;  %1217 = vmatprep.mubr.msk.bf16.mxu0 %vm257_vm0, %v1290_v18  ;;  %1249 = vmatprep.mubr.msk.bf16.mxu1 %vm257_vm0, %v1292_v19  ;;  %v1291_v20 = vld [vmem:[%s2046_s0 + $0x48] sm:$0xff]   ;;  %v1294_v22 = vld [vmem:[%s2046_s0 + $0x50] sm:$0xff]   ;;  %vm647_vm1 = vcmask 253952  }
  0x24   :  { %v1293_v21 = vld [vmem:[%s2046_s0 + $0xc8] sm:$0xff]   ;;  %v1296_v23 = vld [vmem:[%s2046_s0 + $0xd0] sm:$0xff]   ;;  %v1295_v24 = vld [vmem:[%s2046_s0 + $0x58] sm:$0xff]  }
  0x25   :  { %v1297_v25 = vld [vmem:[%s2046_s0 + $0xd8] sm:$0xff]   ;;  %v1298_v26 = vld [vmem:[%s2046_s0 + $0x60] sm:$0xff]   ;;  %v1299_v28 = vld [vmem:[%s2046_s0 + $0x68] sm:$0xff]  }
  0x26   :  { %v1300_v27 = vld [vmem:[%s2046_s0 + $0xe0] sm:$0xff]   ;;  %v1301_v29 = vld [vmem:[%s2046_s0 + $0xe8] sm:$0xff]   ;;  %v1302_v30 = vld [vmem:[%s2046_s0 + $0x70] sm:$0xff]  }
  0x27   :  { %v1304_v31 = vld [vmem:[%s2046_s0 + $0xf0] sm:$0xff]   ;;  %v1303_v32 = vld [vmem:[%s2046_s0 + $0x78] sm:$0xff]  }
  0x28   :  { %v1305_v33 = vld [vmem:[%s2046_s0 + $0xf8] sm:$0xff]  }
  0x2a   :  { %1218 = vmatmul.mubr.msk.bf16.gmra.mrb[16].mxu0 %vm257_vm0, %v1291_v20  ;;  %1250 = vmatmul.mubr.msk.bf16.gmra.mrb[16].mxu1 %vm257_vm0, %v1293_v21 }
  0x2b   :  { %1221 = vmatprep.mubr.msk.bf16.mxu0 %vm257_vm0, %v1294_v22  ;;  %1253 = vmatprep.mubr.msk.bf16.mxu1 %vm257_vm0, %v1296_v23 }
  0x32   :  { %1222 = vmatmul.mubr.msk.bf16.gmra.mrb[20].mxu0 %vm257_vm0, %v1295_v24  ;;  %1254 = vmatmul.mubr.msk.bf16.gmra.mrb[20].mxu1 %vm257_vm0, %v1297_v25 }
  0x33   :  { %1225 = vmatprep.mubr.msk.bf16.mxu0 %vm257_vm0, %v1298_v26  ;;  %1257 = vmatprep.mubr.msk.bf16.mxu1 %vm257_vm0, %v1300_v27 }
  0x3a   :  { %1226 = vmatmul.mubr.msk.bf16.gmra.mrb[24].mxu0 %vm257_vm0, %v1299_v28  ;;  %1258 = vmatmul.mubr.msk.bf16.gmra.mrb[24].mxu1 %vm257_vm0, %v1301_v29 }
  0x3b   :  { %1229 = vmatprep.mubr.msk.bf16.mxu0 %vm257_vm0, %v1302_v30  ;;  %1261 = vmatprep.mubr.msk.bf16.mxu1 %vm257_vm0, %v1304_v31 }
  0x42   :  { %1230 = vmatmul.mubr.msk.bf16.gmra.mrb[28].mxu0 %vm257_vm0, %v1303_v32  ;;  %1262 = vmatmul.mubr.msk.bf16.gmra.mrb[28].mxu1 %vm257_vm0, %v1305_v33 }
  0xdd   :  { %v1518_v34 = vpop.f32.mrb[0].mxu0  ;;  %v1520_v35 = vpop.f32.mrb[0].mxu1 }
  0xde   :  { %v1522_v36 = vpop.f32.mrb[1].mxu0  ;;  %v1524_v37 = vpop.f32.mrb[1].mxu1  ;;  %v790_v43 = vmul.f32 %v1518_v34, %v1518_v34  ;;  %v654_v48 = vsel %vm257_vm0, %v1518_v34, 0.0 }
  0xdf   :  { %v788_v38 = vmul.f32 %v1522_v36, %v1522_v36  ;;  %v1528_v39 = vpop.f32.mrb[2].mxu0  ;;  %v1530_v40 = vpop.f32.mrb[2].mxu1  ;;  %v651_v44 = vsel %vm257_vm0, %v1522_v36, 0.0 }
  0xe0   :  { %v1532_v41 = vpop.f32.mrb[3].mxu0  ;;  %v1534_v42 = vpop.f32.mrb[3].mxu1  ;;  %v791_v50 = vmul.f32 %v1528_v39, %v1528_v39  ;;  %v855_v54 = vsel %vm257_vm0, %v790_v43, 0.0  ;;  %v656_v55 = vsel %vm257_vm0, %v1528_v39, 0.0 }
  0xe1   :  { %v652_v45 = vsel %vm257_vm0, %v1532_v41, 0.0  ;;  %v789_v46 = vmul.f32 %v1532_v41, %v1532_v41  ;;  %v852_v49 = vsel %vm257_vm0, %v788_v38, 0.0 }
  0xe2   :  { %v653_v47 = vadd.f32 %v652_v45, %v651_v44  ;;  %v857_v62 = vsel %vm257_vm0, %v791_v50, 0.0 }
  0xe3   :  { %v853_v51 = vsel %vm257_vm0, %v789_v46, 0.0 }
  0xe4   :  { %v655_v52 = vadd.f32 %v654_v48, %v653_v47  ;;  %v854_v53 = vadd.f32 %v853_v51, %v852_v49 }
  0xe5   :  { %v1553_v56 = vpop.f32.mrb[4].mxu0  ;;  %v1555_v57 = vpop.f32.mrb[4].mxu1 }
  0xe6   :  { %v856_v58 = vadd.f32 %v855_v54, %v854_v53  ;;  %v1557_v59 = vpop.f32.mrb[5].mxu0  ;;  %v657_v60 = vadd.f32 %v656_v55, %v655_v52  ;;  %v1559_v61 = vpop.f32.mrb[5].mxu1  ;;  %v794_v7 = vmul.f32 %v1553_v56, %v1553_v56  ;;  %v662_v13 = vsel %vm257_vm0, %v1553_v56, 0.0 }
  0xe7   :  { %v658_v63 = vsel %vm257_vm0, %v1557_v59, 0.0  ;;  %v792_v0 = vmul.f32 %v1557_v59, %v1557_v59  ;;  %v1566_v1 = vpop.f32.mrb[6].mxu0  ;;  %v1568_v2 = vpop.f32.mrb[6].mxu1 }
  0xe8   :  { %v659_v3 = vadd.f32 %v658_v63, %v657_v60  ;;  %v858_v4 = vadd.f32 %v857_v62, %v856_v58  ;;  %v1570_v5 = vpop.f32.mrb[7].mxu0  ;;  %v1572_v6 = vpop.f32.mrb[7].mxu1  ;;  %v795_v14 = vmul.f32 %v1566_v1, %v1566_v1  ;;  %v863_v18 = vsel %vm257_vm0, %v794_v7, 0.0 }
  0xe9   :  { %v859_v8 = vsel %vm257_vm0, %v792_v0, 0.0  ;;  %v660_v9 = vsel %vm257_vm0, %v1570_v5, 0.0  ;;  %v793_v10 = vmul.f32 %v1570_v5, %v1570_v5  ;;  %v664_v19 = vsel %vm257_vm0, %v1566_v1, 0.0 }
  0xea   :  { %v860_v11 = vadd.f32 %v859_v8, %v858_v4  ;;  %v661_v12 = vadd.f32 %v660_v9, %v659_v3  ;;  %v865_v26 = vsel %vm257_vm0, %v795_v14, 0.0 }
  0xeb   :  { %v861_v15 = vsel %vm257_vm0, %v793_v10, 0.0 }
  0xec   :  { %v663_v16 = vadd.f32 %v662_v13, %v661_v12  ;;  %v862_v17 = vadd.f32 %v861_v15, %v860_v11 }
  0xed   :  { %v1589_v20 = vpop.f32.mrb[8].mxu0  ;;  %v1591_v21 = vpop.f32.mrb[8].mxu1 }
  0xee   :  { %v864_v22 = vadd.f32 %v863_v18, %v862_v17  ;;  %v1593_v23 = vpop.f32.mrb[9].mxu0  ;;  %v665_v24 = vadd.f32 %v664_v19, %v663_v16  ;;  %v1595_v25 = vpop.f32.mrb[9].mxu1  ;;  %v798_v43 = vmul.f32 %v1589_v20, %v1589_v20  ;;  %v670_v49 = vsel %vm257_vm0, %v1589_v20, 0.0 }
  0xef   :  { %v666_v27 = vsel %vm257_vm0, %v1593_v23, 0.0  ;;  %v796_v28 = vmul.f32 %v1593_v23, %v1593_v23  ;;  %v1602_v29 = vpop.f32.mrb[10].mxu0  ;;  %v1604_v30 = vpop.f32.mrb[10].mxu1 }
  0xf0   :  { %v667_v31 = vadd.f32 %v666_v27, %v665_v24  ;;  %v866_v32 = vadd.f32 %v865_v26, %v864_v22  ;;  %v1606_v33 = vpop.f32.mrb[11].mxu0  ;;  %v1608_v38 = vpop.f32.mrb[11].mxu1  ;;  %v799_v50 = vmul.f32 %v1602_v29, %v1602_v29  ;;  %v871_v54 = vsel %vm257_vm0, %v798_v43, 0.0 }
  0xf1   :  { %v867_v44 = vsel %vm257_vm0, %v796_v28, 0.0  ;;  %v668_v45 = vsel %vm257_vm0, %v1606_v33, 0.0  ;;  %v797_v46 = vmul.f32 %v1606_v33, %v1606_v33  ;;  %v672_v55 = vsel %vm257_vm0, %v1602_v29, 0.0 }
  0xf2   :  { %v868_v47 = vadd.f32 %v867_v44, %v866_v32  ;;  %v669_v48 = vadd.f32 %v668_v45, %v667_v31  ;;  %v873_v4 = vsel %vm257_vm0, %v799_v50, 0.0 }
  0xf3   :  { %v869_v51 = vsel %vm257_vm0, %v797_v46, 0.0 }
  0xf4   :  { %v671_v52 = vadd.f32 %v670_v49, %v669_v48  ;;  %v870_v53 = vadd.f32 %v869_v51, %v868_v47 }
  0xf5   :  { %v1625_v58 = vpop.f32.mrb[12].mxu0  ;;  %v1627_v60 = vpop.f32.mrb[12].mxu1 }
  0xf6   :  { %v872_v62 = vadd.f32 %v871_v54, %v870_v53  ;;  %v1629_v63 = vpop.f32.mrb[13].mxu0  ;;  %v673_v0 = vadd.f32 %v672_v55, %v671_v52  ;;  %v1631_v3 = vpop.f32.mrb[13].mxu1  ;;  %v802_v15 = vmul.f32 %v1625_v58, %v1625_v58  ;;  %v678_v26 = vsel %vm257_vm0, %v1625_v58, 0.0 }
  0xf7   :  { %v674_v7 = vsel %vm257_vm0, %v1629_v63, 0.0  ;;  %v800_v8 = vmul.f32 %v1629_v63, %v1629_v63  ;;  %v1638_v9 = vpop.f32.mrb[14].mxu0  ;;  %v1640_v10 = vpop.f32.mrb[14].mxu1 }
  0xf8   :  { %v675_v11 = vadd.f32 %v674_v7, %v673_v0  ;;  %v874_v12 = vadd.f32 %v873_v4, %v872_v62  ;;  %v1642_v13 = vpop.f32.mrb[15].mxu0  ;;  %v1644_v14 = vpop.f32.mrb[15].mxu1  ;;  %v803_v22 = vmul.f32 %v1638_v9, %v1638_v9  ;;  %v879_v32 = vsel %vm257_vm0, %v802_v15, 0.0 }
  0xf9   :  { %v875_v16 = vsel %vm257_vm0, %v800_v8, 0.0  ;;  %v676_v17 = vsel %vm257_vm0, %v1642_v13, 0.0  ;;  %v801_v18 = vmul.f32 %v1642_v13, %v1642_v13  ;;  %v680_v45 = vsel %vm257_vm0, %v1638_v9, 0.0 }
  0xfa   :  { %v876_v19 = vadd.f32 %v875_v16, %v874_v12  ;;  %v677_v24 = vadd.f32 %v676_v17, %v675_v11  ;;  %v881_v46 = vsel %vm257_vm0, %v803_v22, 0.0 }
  0xfb   :  { %v877_v27 = vsel %vm257_vm0, %v801_v18, 0.0 }
  0xfc   :  { %v679_v28 = vadd.f32 %v678_v26, %v677_v24  ;;  %v878_v31 = vadd.f32 %v877_v27, %v876_v19 }
  0xfd   :  { %v1219_v43 = vpop.f32.mrb[16].mxu0  ;;  %v1659_v44 = vpop.f32.mrb[16].mxu1 }
  0xfe   :  { %v880_v47 = vadd.f32 %v879_v32, %v878_v31  ;;  %v989_v48 = vmax.f32 %v1518_v34, %v1219_v43  ;;  %v452_v49 = vpop.f32.mrb[17].mxu0  ;;  %v1665_v50 = vpop.f32.mrb[17].mxu1  ;;  %v681_v51 = vadd.f32 %v680_v45, %v679_v28  ;;  %v806_v12 = vmul.f32 %v1219_v43, %v1219_v43 }
  0xff   :  { %v682_v52 = vsel %vm257_vm0, %v452_v49, 0.0  ;;  %v804_v53 = vmul.f32 %v452_v49, %v452_v49  ;;  %v987_v54 = vmax.f32 %v1522_v36, %v452_v49  ;;  %v1220_v55 = vpop.f32.mrb[18].mxu0  ;;  %v1669_v62 = vpop.f32.mrb[18].mxu1  ;;  %v686_v19 = vsel %vm257_vm0, %v1219_v43, 0.0 }
 0x100   :  { %v882_v0 = vadd.f32 %v881_v46, %v880_v47  ;;  %v455_v4 = vpop.f32.mrb[19].mxu0  ;;  %v1671_v7 = vpop.f32.mrb[19].mxu1  ;;  %v683_v8 = vadd.f32 %v682_v52, %v681_v51  ;;  %v990_v34 = vmax.f32 %v1528_v39, %v1220_v55  ;;  %v1005_v24 = vmax.f32 %v989_v48, %v1520_v35 }
 0x101   :  { %v883_v11 = vsel %vm257_vm0, %v804_v53, 0.0  ;;  %v684_v16 = vsel %vm257_vm0, %v455_v4, 0.0  ;;  %v805_v17 = vmul.f32 %v455_v4, %v455_v4  ;;  %v988_v36 = vmax.f32 %v1532_v41, %v455_v4 }
 0x102   :  { %v884_v15 = vadd.f32 %v883_v11, %v882_v0  ;;  %v685_v18 = vadd.f32 %v684_v16, %v683_v8  ;;  %v1003_v28 = vmax.f32 %v987_v54, %v1524_v37  ;;  %v887_v32 = vsel %vm257_vm0, %v806_v12, 0.0 }
 0x103   :  { %v885_v22 = vsel %vm257_vm0, %v805_v17, 0.0  ;;  %v807_v45 = vmul.f32 %v1220_v55, %v1220_v55  ;;  %v1021_v46 = vmax.f32 %v1005_v24, %v1659_v44  ;;  %v1006_v48 = vmax.f32 %v990_v34, %v1530_v40 }
 0x104   :  { %v687_v26 = vadd.f32 %v686_v19, %v685_v18  ;;  %v886_v27 = vadd.f32 %v885_v22, %v884_v15  ;;  %v1019_v49 = vmax.f32 %v1003_v28, %v1665_v50  ;;  %v1004_v53 = vmax.f32 %v988_v36, %v1534_v42 }
 0x105   :  { %v1223_v31 = vpop.f32.mrb[20].mxu0  ;;  %v1681_v39 = vpop.f32.mrb[20].mxu1  ;;  %1037 = vst.msk [vmem:[%s2048_s2 + $0x10] sm:$0xff] %vm257_vm0, %v1021_v46  ;;  %v688_v4 = vsel %vm257_vm0, %v1220_v55, 0.0  ;;  %v1022_v8 = vmax.f32 %v1006_v48, %v1669_v62  ;;  %v889_v34 = vsel %vm257_vm0, %v807_v45, 0.0 }
 0x106   :  { %v468_v47 = vpop.f32.mrb[21].mxu0  ;;  %v1685_v41 = vpop.f32.mrb[21].mxu1  ;;  %v888_v43 = vadd.f32 %v887_v32, %v886_v27  ;;  %1035 = vst.msk [vmem:[%s2048_s2] sm:$0xff] %vm257_vm0, %v1019_v49  ;;  %v993_v11 = vmax.f32 %v1553_v56, %v1223_v31  ;;  %v1020_v12 = vmax.f32 %v1004_v53, %v1671_v7  ;;  %v689_v15 = vadd.f32 %v688_v4, %v687_v26 }
 0x107   :  { %v1224_v51 = vpop.f32.mrb[22].mxu0  ;;  %v1689_v52 = vpop.f32.mrb[22].mxu1  ;;  %v690_v16 = vsel %vm257_vm0, %v468_v47, 0.0  ;;  %1038 = vst.msk [vmem:[%s2048_s2 + $0x18] sm:$0xff] %vm257_vm0, %v1022_v8  ;;  %v808_v55 = vmul.f32 %v468_v47, %v468_v47  ;;  %v991_v18 = vmax.f32 %v1557_v59, %v468_v47  ;;  %v810_v56 = vmul.f32 %v1223_v31, %v1223_v31 }
 0x108   :  { %2053 = vst [vmem:[#allocation8_spill] sm:$0xff] %v1689_v52  ;;  %v471_v54 = vpop.f32.mrb[23].mxu0  ;;  %v1696_v0 = vpop.f32.mrb[23].mxu1  ;;  %v890_v17 = vadd.f32 %v889_v34, %v888_v43  ;;  %1036 = vst.msk [vmem:[%s2048_s2 + $0x8] sm:$0xff] %vm257_vm0, %v1020_v12  ;;  %v691_v36 = vadd.f32 %v690_v16, %v689_v15  ;;  %v994_v19 = vmax.f32 %v1566_v1, %v1224_v51  ;;  %v694_v43 = vsel %vm257_vm0, %v1223_v31, 0.0 }
 0x109   :  { %v891_v22 = vsel %vm257_vm0, %v808_v55, 0.0  ;;  %v692_v24 = vsel %vm257_vm0, %v471_v54, 0.0  ;;  %v809_v26 = vmul.f32 %v471_v54, %v471_v54  ;;  %v992_v27 = vmax.f32 %v1570_v5, %v471_v54 }
 0x10a   :  { %v892_v59 = vadd.f32 %v891_v22, %v890_v17  ;;  %v693_v45 = vadd.f32 %v692_v24, %v691_v36  ;;  %v1009_v1 = vmax.f32 %v993_v11, %v1555_v57  ;;  %v1007_v5 = vmax.f32 %v991_v18, %v1559_v61 }
 0x10b   :  { %v893_v49 = vsel %vm257_vm0, %v809_v26, 0.0  ;;  %v895_v12 = vsel %vm257_vm0, %v810_v56, 0.0  ;;  %v811_v15 = vmul.f32 %v1224_v51, %v1224_v51  ;;  %v1010_v11 = vmax.f32 %v994_v19, %v1568_v2 }
 0x10c   :  { %v695_v4 = vadd.f32 %v694_v43, %v693_v45  ;;  %v894_v8 = vadd.f32 %v893_v49, %v892_v59  ;;  %v1025_v16 = vmax.f32 %v1009_v1, %v1681_v39  ;;  %v1023_v55 = vmax.f32 %v1007_v5, %v1685_v41 }
 0x10d   :  { %v1227_v28 = vpop.f32.mrb[24].mxu0  ;;  %v1721_v32 = vpop.f32.mrb[24].mxu1  ;;  %v1008_v17 = vmax.f32 %v992_v27, %v1572_v6  ;;  %v696_v18 = vsel %vm257_vm0, %v1224_v51, 0.0  ;;  %v1026_v56 = vmax.f32 %v1010_v11, %v1689_v52  ;;  %v897_v19 = vsel %vm257_vm0, %v811_v15, 0.0 }
 0x10e   :  { %v484_v46 = vpop.f32.mrb[25].mxu0  ;;  %v1723_v47 = vpop.f32.mrb[25].mxu1  ;;  %v896_v31 = vadd.f32 %v895_v12, %v894_v8  ;;  %1041 = vst.msk [vmem:[%s2048_s2 + $0x30] sm:$0xff] %vm257_vm0, %v1025_v16  ;;  %1039 = vst.msk [vmem:[%s2048_s2 + $0x20] sm:$0xff] %vm257_vm0, %v1023_v55  ;;  %v997_v36 = vmax.f32 %v1589_v20, %v1227_v28  ;;  %v697_v24 = vadd.f32 %v696_v18, %v695_v4  ;;  %v702_v18 = vsel %vm257_vm0, %v1227_v28, 0.0 }
 0x10f   :  { %v1228_v48 = vpop.f32.mrb[26].mxu0  ;;  %v1728_v53 = vpop.f32.mrb[26].mxu1  ;;  %v1024_v22 = vmax.f32 %v1008_v17, %v1696_v0  ;;  %v698_v26 = vsel %vm257_vm0, %v484_v46, 0.0  ;;  %1042 = vst.msk [vmem:[%s2048_s2 + $0x38] sm:$0xff] %vm257_vm0, %v1026_v56  ;;  %v812_v51 = vmul.f32 %v484_v46, %v484_v46  ;;  %v995_v20 = vmax.f32 %v1593_v23, %v484_v46 }
 0x110   :  { %v487_v54 = vpop.f32.mrb[27].mxu0  ;;  %v1731_v34 = vpop.f32.mrb[27].mxu1  ;;  %v898_v45 = vadd.f32 %v897_v19, %v896_v31  ;;  %v814_v1 = vmul.f32 %v1227_v28, %v1227_v28  ;;  %v699_v4 = vadd.f32 %v698_v26, %v697_v24  ;;  %v998_v8 = vmax.f32 %v1602_v29, %v1228_v48 }
 0x111   :  { %1040 = vst.msk [vmem:[%s2048_s2 + $0x28] sm:$0xff] %vm257_vm0, %v1024_v22  ;;  %v899_v15 = vsel %vm257_vm0, %v812_v51, 0.0  ;;  %v700_v23 = vsel %vm257_vm0, %v487_v54, 0.0  ;;  %v813_v46 = vmul.f32 %v487_v54, %v487_v54  ;;  %v996_v16 = vmax.f32 %v1606_v33, %v487_v54 }
 0x112   :  { %v900_v11 = vadd.f32 %v899_v15, %v898_v45  ;;  %v701_v17 = vadd.f32 %v700_v23, %v699_v4  ;;  %v1013_v56 = vmax.f32 %v997_v36, %v1591_v21  ;;  %v1011_v24 = vmax.f32 %v995_v20, %v1595_v25 }
 0x113   :  { %v901_v29 = vsel %vm257_vm0, %v813_v46, 0.0  ;;  %v903_v26 = vsel %vm257_vm0, %v814_v1, 0.0  ;;  %v815_v51 = vmul.f32 %v1228_v48, %v1228_v48  ;;  %v1014_v45 = vmax.f32 %v998_v8, %v1604_v30 }
 0x114   :  { %v703_v19 = vadd.f32 %v702_v18, %v701_v17  ;;  %v902_v22 = vadd.f32 %v901_v29, %v900_v11  ;;  %v1029_v33 = vmax.f32 %v1013_v56, %v1721_v32  ;;  %v1027_v52 = vmax.f32 %v1011_v24, %v1723_v47 }
 0x115   :  { %v1752_v59 = vpop.f32.mrb[28].mxu0  ;;  %v1754_v27 = vpop.f32.mrb[28].mxu1  ;;  %v1012_v28 = vmax.f32 %v996_v16, %v1608_v38  ;;  %v704_v36 = vsel %vm257_vm0, %v1228_v48, 0.0  ;;  %v1030_v20 = vmax.f32 %v1014_v45, %v1728_v53  ;;  %v905_v4 = vsel %vm257_vm0, %v815_v51, 0.0 }
 0x116   :  { %v500_v43 = vpop.f32.mrb[29].mxu0  ;;  %v1761_v49 = vpop.f32.mrb[29].mxu1  ;;  %v904_v54 = vadd.f32 %v903_v26, %v902_v22  ;;  %1045 = vst.msk [vmem:[%s2048_s2 + $0x50] sm:$0xff] %vm257_vm0, %v1029_v33  ;;  %1043 = vst.msk [vmem:[%s2048_s2 + $0x40] sm:$0xff] %vm257_vm0, %v1027_v52  ;;  %v1001_v1 = vmax.f32 %v1625_v58, %v1752_v59  ;;  %v705_v15 = vadd.f32 %v704_v36, %v703_v19  ;;  %v710_v22 = vsel %vm257_vm0, %v1752_v59, 0.0 }
 0x117   :  { %v1768_v5 = vpop.f32.mrb[30].mxu0  ;;  %v1770_v12 = vpop.f32.mrb[30].mxu1  ;;  %v1028_v8 = vmax.f32 %v1012_v28, %v1731_v34  ;;  %v706_v23 = vsel %vm257_vm0, %v500_v43, 0.0  ;;  %1046 = vst.msk [vmem:[%s2048_s2 + $0x58] sm:$0xff] %vm257_vm0, %v1030_v20  ;;  %v816_v48 = vmul.f32 %v500_v43, %v500_v43  ;;  %v999_v52 = vmax.f32 %v1629_v63, %v500_v43 }
 0x118   :  { %v1775_v31 = vpop.f32.mrb[31].mxu0  ;;  %v1777_v55 = vpop.f32.mrb[31].mxu1  ;;  %v906_v46 = vadd.f32 %v905_v4, %v904_v54  ;;  %v818_v58 = vmul.f32 %v1752_v59, %v1752_v59  ;;  %v707_v16 = vadd.f32 %v706_v23, %v705_v15  ;;  %v1002_v11 = vmax.f32 %v1638_v9, %v1768_v5 }
 0x119   :  { %1044 = vst.msk [vmem:[%s2048_s2 + $0x48] sm:$0xff] %vm257_vm0, %v1028_v8  ;;  %v907_v17 = vsel %vm257_vm0, %v816_v48, 0.0  ;;  %v708_v18 = vsel %vm257_vm0, %v1775_v31, 0.0  ;;  %v817_v63 = vmul.f32 %v1775_v31, %v1775_v31  ;;  %v1000_v43 = vmax.f32 %v1642_v13, %v1775_v31 }
 0x11a   :  { %v820_v29 = vmul.f32 %v1524_v37, %v1524_v37  ;;  %v908_v56 = vadd.f32 %v907_v17, %v906_v46  ;;  %v709_v19 = vadd.f32 %v708_v18, %v707_v16  ;;  %v819_v9 = vmul.f32 %v1768_v5, %v1768_v5 }
 0x11b   :  { %v909_v24 = vsel %vm257_vm0, %v817_v63, 0.0  ;;  %v1017_v26 = vmax.f32 %v1001_v1, %v1627_v60  ;;  %v1015_v54 = vmax.f32 %v999_v52, %v1631_v3  ;;  %v714_v13 = vsel %vm257_vm0, %v1524_v37, 0.0 }
 0x11c   :  { %v711_v51 = vadd.f32 %v710_v22, %v709_v19  ;;  %v910_v33 = vadd.f32 %v909_v24, %v908_v56  ;;  %v911_v31 = vsel %vm257_vm0, %v818_v58, 0.0  ;;  %v712_v45 = vsel %vm257_vm0, %v1768_v5, 0.0 }
 0x11d   :  { %v1033_v59 = vmax.f32 %v1017_v26, %v1754_v27  ;;  %v1031_v20 = vmax.f32 %v1015_v54, %v1761_v49  ;;  %v915_v1 = vsel %vm257_vm0, %v820_v29, 0.0  ;;  %v821_v4 = vmul.f32 %v1534_v42, %v1534_v42 }
 0x11e   :  { %v713_v28 = vadd.f32 %v712_v45, %v711_v51  ;;  %v912_v36 = vadd.f32 %v911_v31, %v910_v33  ;;  %v913_v8 = vsel %vm257_vm0, %v819_v9, 0.0  ;;  %v1018_v37 = vmax.f32 %v1002_v11, %v1640_v10 }
 0x11f   :  { %1049 = vst.msk [vmem:[%s2048_s2 + $0x70] sm:$0xff] %vm257_vm0, %v1033_v59  ;;  %1047 = vst.msk [vmem:[%s2048_s2 + $0x60] sm:$0xff] %vm257_vm0, %v1031_v20  ;;  %v1016_v23 = vmax.f32 %v1000_v43, %v1644_v14  ;;  %v822_v48 = vmul.f32 %v1520_v35, %v1520_v35  ;;  %v716_v46 = vsel %vm257_vm0, %v1534_v42, 0.0  ;;  %v1356_v17 = vmov 0.0  }
 0x120   :  { %v715_v5 = vadd.f32 %v714_v13, %v713_v28  ;;  %v914_v15 = vadd.f32 %v913_v8, %v912_v36  ;;  %v1034_v52 = vmax.f32 %v1018_v37, %v1770_v12  ;;  %648 = vst.msk [vmem:[#allocation2] sm:$0x1] %vm647_vm1, %v1356_v17  ;;  %649 = vst.msk [vmem:[#allocation4] sm:$0x1] %vm647_vm1, %v1356_v17  ;;  %v718_v18 = vsel %vm257_vm0, %v1520_v35, 0.0 }
 0x121   :  { %v1032_v11 = vmax.f32 %v1016_v23, %v1777_v55  ;;  %v823_v63 = vmul.f32 %v1530_v40, %v1530_v40  ;;  %v917_v43 = vsel %vm257_vm0, %v821_v4, 0.0  ;;  %v824_v42 = vmul.f32 %v1559_v61, %v1559_v61 }
 0x122   :  { %v717_v58 = vadd.f32 %v716_v46, %v715_v5  ;;  %v916_v16 = vadd.f32 %v915_v1, %v914_v15  ;;  %1050 = vst.msk [vmem:[%s2048_s2 + $0x78] sm:$0xff] %vm257_vm0, %v1034_v52  ;;  %v919_v35 = vsel %vm257_vm0, %v822_v48, 0.0  ;;  %v720_v19 = vsel %vm257_vm0, %v1530_v40, 0.0 }
 0x123   :  { %1048 = vst.msk [vmem:[%s2048_s2 + $0x68] sm:$0xff] %vm257_vm0, %v1032_v11  ;;  %v722_v22 = vsel %vm257_vm0, %v1559_v61, 0.0  ;;  %v921_v26 = vsel %vm257_vm0, %v823_v63, 0.0  ;;  %v923_v51 = vsel %vm257_vm0, %v824_v42, 0.0  ;;  %v825_v33 = vmul.f32 %v1572_v6, %v1572_v6  ;;  %s1357_s2 = smov [#allocation2]  }
 0x124   :  { %v719_v29 = vadd.f32 %v718_v18, %v717_v58  ;;  %v918_v56 = vadd.f32 %v917_v43, %v916_v16  ;;  %v826_v31 = vmul.f32 %v1555_v57, %v1555_v57  ;;  %v724_v40 = vsel %vm257_vm0, %v1572_v6, 0.0  ;;  %s1073_s5 = sshll.u32 %s1357_s2, 4  ;;  %s1074_s5 = int_to_ptr.vmem [resolvable:$true] %s1073_s5 }
 0x125   :  { %v726_v61 = vsel %vm257_vm0, %v1555_v57, 0.0  ;;  %v827_v28 = vmul.f32 %v1568_v2, %v1568_v2  ;;  %v925_v36 = vsel %vm257_vm0, %v825_v33, 0.0  ;;  %v828_v20 = vmul.f32 %v1595_v25, %v1595_v25  ;;  %s1308_s6 = scalar_lea.vmem %s1074_s5, 16  ;;  %s1312_s7 = scalar_lea.vmem %s1074_s5, 32 }
 0x126   :  { %v721_v9 = vadd.f32 %v720_v19, %v719_v29  ;;  %v920_v24 = vadd.f32 %v919_v35, %v918_v56  ;;  %v927_v8 = vsel %vm257_vm0, %v826_v31, 0.0  ;;  %v728_v6 = vsel %vm257_vm0, %v1568_v2, 0.0  ;;  %p1309_p0 = scmp.ne.s32.totalorder %s1074_s5, %s1308_s6  ;;  %p1313_p1 = scmp.lt.s32.totalorder %s1074_s5, %s1074_s5 }
 0x127   :  { %v730_v37 = vsel %vm257_vm0, %v1595_v25, 0.0  ;;  %v929_v15 = vsel %vm257_vm0, %v827_v28, 0.0  ;;  %v931_v23 = vsel %vm257_vm0, %v828_v20, 0.0  ;;  %v829_v48 = vmul.f32 %v1608_v38, %v1608_v38  ;;  %p1314_p2 = scmp.lt.s32.totalorder %s1312_s7, %s1308_s6 }
 0x128   :  { %v723_v54 = vadd.f32 %v722_v22, %v721_v9  ;;  %v922_v13 = vadd.f32 %v921_v26, %v920_v24  ;;  %v830_v58 = vmul.f32 %v1591_v21, %v1591_v21  ;;  %v732_v2 = vsel %vm257_vm0, %v1608_v38, 0.0 }
 0x129   :  { %v734_v25 = vsel %vm257_vm0, %v1591_v21, 0.0  ;;  %v831_v17 = vmul.f32 %v1604_v30, %v1604_v30  ;;  %v933_v18 = vsel %vm257_vm0, %v829_v48, 0.0  ;;  %v832_v63 = vmul.f32 %v1631_v3, %v1631_v3  ;;  %p1315_p3 = por %p1314_p2, %p1313_p1 }
 0x12a   :  { %v725_v45 = vadd.f32 %v724_v40, %v723_v54  ;;  %v924_v59 = vadd.f32 %v923_v51, %v922_v13  ;;  %v935_v29 = vsel %vm257_vm0, %v830_v58, 0.0  ;;  %v736_v38 = vsel %vm257_vm0, %v1604_v30, 0.0 }
 0x12b   :  { %v738_v56 = vsel %vm257_vm0, %v1631_v3, 0.0  ;;  %v937_v19 = vsel %vm257_vm0, %v831_v17, 0.0  ;;  %v939_v22 = vsel %vm257_vm0, %v832_v63, 0.0  ;;  %v833_v9 = vmul.f32 %v1644_v14, %v1644_v14  ;;  %p1316_p4 = pnand %p1315_p3, %p1309_p0 }
 0x12c   :  { %v727_v1 = vadd.f32 %v726_v61, %v725_v45  ;;  %v926_v4 = vadd.f32 %v925_v36, %v924_v59  ;;  %v834_v51 = vmul.f32 %v1627_v60, %v1627_v60  ;;  %v740_v30 = vsel %vm257_vm0, %v1644_v14, 0.0 }
 0x12d   :  { %v742_v3 = vsel %vm257_vm0, %v1627_v60, 0.0  ;;  %v835_v13 = vmul.f32 %v1640_v10, %v1640_v10  ;;  %v941_v31 = vsel %vm257_vm0, %v833_v9, 0.0  ;;  %v836_v40 = vmul.f32 %v1665_v50, %v1665_v50 }
 0x12e   :  { %v729_v5 = vadd.f32 %v728_v6, %v727_v1  ;;  %v928_v57 = vadd.f32 %v927_v8, %v926_v4  ;;  %v943_v61 = vsel %vm257_vm0, %v834_v51, 0.0  ;;  %v744_v14 = vsel %vm257_vm0, %v1640_v10, 0.0 }
 0x12f   :  { %v746_v28 = vsel %vm257_vm0, %v1665_v50, 0.0  ;;  %v945_v20 = vsel %vm257_vm0, %v835_v13, 0.0  ;;  %v947_v1 = vsel %vm257_vm0, %v836_v40, 0.0  ;;  %v837_v4 = vmul.f32 %v1671_v7, %v1671_v7 }
 0x130   :  { %v731_v46 = vadd.f32 %v730_v37, %v729_v5  ;;  %v930_v52 = vadd.f32 %v929_v15, %v928_v57  ;;  %v838_v37 = vmul.f32 %v1659_v44, %v1659_v44  ;;  %v748_v10 = vsel %vm257_vm0, %v1671_v7, 0.0 }
 0x131   :  { %v750_v50 = vsel %vm257_vm0, %v1659_v44, 0.0  ;;  %v839_v15 = vmul.f32 %v1669_v62, %v1669_v62  ;;  %v840_v48 = vmul.f32 %v1685_v41, %v1685_v41  ;;  %v752_v7 = vsel %vm257_vm0, %v1669_v62, 0.0 }
 0x132   :  { %v733_v16 = vadd.f32 %v732_v2, %v731_v46  ;;  %v932_v11 = vadd.f32 %v931_v23, %v930_v52  ;;  %v949_v23 = vsel %vm257_vm0, %v837_v4, 0.0  ;;  %v951_v58 = vsel %vm257_vm0, %v838_v37, 0.0 }
 0x133   :  { %v754_v2 = vsel %vm257_vm0, %v1685_v41, 0.0  ;;  %v841_v17 = vmul.f32 %v1696_v0, %v1696_v0  ;;  %v756_v62 = vsel %vm257_vm0, %v1696_v0, 0.0  ;;  %v758_v41 = vsel %vm257_vm0, %v1681_v39, 0.0 }
 0x134   :  { %v735_v43 = vadd.f32 %v734_v25, %v733_v16  ;;  %v934_v42 = vadd.f32 %v933_v18, %v932_v11  ;;  %v953_v11 = vsel %vm257_vm0, %v839_v15, 0.0  ;;  %v955_v25 = vsel %vm257_vm0, %v840_v48, 0.0 }
 0x135   :  { %v846_v13 = vmul.f32 %v1721_v32, %v1721_v32  ;;  %v851_v15 = vmul.f32 %v1770_v12, %v1770_v12 }
 0x136   :  { %v737_v35 = vadd.f32 %v736_v38, %v735_v43  ;;  %v936_v21 = vadd.f32 %v935_v29, %v934_v42  ;;  %v842_v43 = vmul.f32 %v1681_v39, %v1681_v39  ;;  %v2054_v38 = vld [vmem:[#allocation8_spill] sm:$0xff] }
 0x137   :  { %v760_v0 = vsel %vm257_vm0, %v2054_v38, 0.0 }
 0x138   :  { %v739_v24 = vadd.f32 %v738_v56, %v737_v35  ;;  %v938_v26 = vadd.f32 %v937_v19, %v936_v21  ;;  %v843_v56 = vmul.f32 %v2054_v38, %v2054_v38  ;;  %v957_v35 = vsel %vm257_vm0, %v841_v17, 0.0  ;;  %v787_v38 = vld [vmem:[#allocation4] sm:$0x1] }
 0x139   :  { %v844_v21 = vmul.f32 %v1723_v47, %v1723_v47  ;;  %v959_v9 = vsel %vm257_vm0, %v842_v43, 0.0 }
 0x13a   :  { %v940_v33 = vadd.f32 %v939_v22, %v938_v26  ;;  %v741_v54 = vadd.f32 %v740_v30, %v739_v24  ;;  %v762_v24 = vsel %vm257_vm0, %v1723_v47, 0.0  ;;  %v961_v51 = vsel %vm257_vm0, %v843_v56, 0.0 }
 0x13b   :  { %v963_v30 = vsel %vm257_vm0, %v844_v21, 0.0  ;;  %v766_v47 = vsel %vm257_vm0, %v1721_v32, 0.0 }
 0x13c   :  { %v743_v45 = vadd.f32 %v742_v3, %v741_v54  ;;  %v942_v59 = vadd.f32 %v941_v31, %v940_v33  ;;  %v845_v33 = vmul.f32 %v1731_v34, %v1731_v34  ;;  %v764_v31 = vsel %vm257_vm0, %v1731_v34, 0.0 }
 0x13d   :  { %v768_v34 = vsel %vm257_vm0, %v1728_v53, 0.0 }
 0x13e   :  { %v745_v36 = vadd.f32 %v744_v14, %v743_v45  ;;  %v944_v60 = vadd.f32 %v943_v61, %v942_v59  ;;  %v847_v59 = vmul.f32 %v1728_v53, %v1728_v53  ;;  %v965_v61 = vsel %vm257_vm0, %v845_v33, 0.0 }
 0x13f   :  { %v848_v14 = vmul.f32 %v1761_v49, %v1761_v49  ;;  %v772_v53 = vsel %vm257_vm0, %v1777_v55, 0.0 }
 0x140   :  { %v747_v8 = vadd.f32 %v746_v28, %v745_v36  ;;  %v946_v6 = vadd.f32 %v945_v20, %v944_v60  ;;  %v967_v60 = vsel %vm257_vm0, %v846_v13, 0.0  ;;  %v770_v20 = vsel %vm257_vm0, %v1761_v49, 0.0 }
 0x141   :  { %v969_v4 = vsel %vm257_vm0, %v847_v59, 0.0  ;;  %v774_v49 = vsel %vm257_vm0, %v1754_v27, 0.0 }
 0x142   :  { %v749_v5 = vadd.f32 %v748_v10, %v747_v8  ;;  %v948_v57 = vadd.f32 %v947_v1, %v946_v6  ;;  %v971_v8 = vsel %vm257_vm0, %v848_v14, 0.0  ;;  %v849_v6 = vmul.f32 %v1777_v55, %v1777_v55 }
 0x143   :  { %v977_v55 = vsel %vm257_vm0, %v851_v15, 0.0 }
 0x144   :  { %v751_v46 = vadd.f32 %v750_v50, %v749_v5  ;;  %v950_v52 = vadd.f32 %v949_v23, %v948_v57  ;;  %v850_v5 = vmul.f32 %v1754_v27, %v1754_v27  ;;  %v973_v23 = vsel %vm257_vm0, %v849_v6, 0.0 }
 0x146   :  { %v753_v16 = vadd.f32 %v752_v7, %v751_v46  ;;  %v952_v44 = vadd.f32 %v951_v58, %v950_v52  ;;  %v975_v52 = vsel %vm257_vm0, %v850_v5, 0.0  ;;  %v776_v58 = vsel %vm257_vm0, %v1770_v12, 0.0 }
 0x148   :  { %v755_v18 = vadd.f32 %v754_v2, %v753_v16  ;;  %v954_v63 = vadd.f32 %v953_v11, %v952_v44 }
 0x14a   :  { %v757_v42 = vadd.f32 %v756_v62, %v755_v18  ;;  %v956_v29 = vadd.f32 %v955_v25, %v954_v63 }
 0x14c   :  { %v759_v19 = vadd.f32 %v758_v41, %v757_v42  ;;  %v958_v22 = vadd.f32 %v957_v35, %v956_v29  ;;  %v650_v42 = vld [vmem:[#allocation2] sm:$0x1] }
 0x14e   :  { %v761_v26 = vadd.f32 %v760_v0, %v759_v19  ;;  %v960_v39 = vadd.f32 %v959_v9, %v958_v22 }
 0x150   :  { %v763_v54 = vadd.f32 %v762_v24, %v761_v26  ;;  %v962_v3 = vadd.f32 %v961_v51, %v960_v39 }
 0x152   :  { %v765_v40 = vadd.f32 %v764_v31, %v763_v54  ;;  %v964_v45 = vadd.f32 %v963_v30, %v962_v3 }
 0x154   :  { %v767_v28 = vadd.f32 %v766_v47, %v765_v40  ;;  %v966_v36 = vadd.f32 %v965_v61, %v964_v45 }
 0x156   :  { %v769_v1 = vadd.f32 %v768_v34, %v767_v28  ;;  %v968_v32 = vadd.f32 %v967_v60, %v966_v36 }
 0x158   :  { %v771_v37 = vadd.f32 %v770_v20, %v769_v1  ;;  %v970_v10 = vadd.f32 %v969_v4, %v968_v32 }
 0x15a   :  { %v972_v57 = vadd.f32 %v971_v8, %v970_v10  ;;  %v773_v50 = vadd.f32 %v772_v53, %v771_v37 }
 0x15c   :  { %v775_v48 = vadd.f32 %v774_v49, %v773_v50  ;;  %v974_v46 = vadd.f32 %v973_v23, %v972_v57 }
 0x15e   :  { %v777_v7 = vadd.f32 %v776_v58, %v775_v48  ;;  %v976_v2 = vadd.f32 %v975_v52, %v974_v46 }
 0x160   :  { %v778_v16 = vrot.slane %v777_v7, 4  ;;  %v978_v44 = vadd.f32 %v977_v55, %v976_v2 }
 0x162   :  { %v779_v11 = vadd.f32 %v778_v16, %v777_v7  ;;  %v979_v27 = vrot.slane %v978_v44, 4 }
 0x164   :  { %v780_v25 = vrot.slane %v779_v11, 2  ;;  %v980_v17 = vadd.f32 %v979_v27, %v978_v44 }
 0x166   :  { %v781_v18 = vadd.f32 %v780_v25, %v779_v11  ;;  %v981_v63 = vrot.slane %v980_v17, 2 }
 0x168   :  { %v782_v43 = vrot.slane %v781_v18, 1  ;;  %v982_v62 = vadd.f32 %v981_v63, %v980_v17 }
 0x16a   :  { %v783_v29 = vadd.f32 %v782_v43, %v781_v18  ;;  %v983_v41 = vrot.slane %v982_v62, 1 }
 0x16c   :  { %v784_v56 = vadd.f32 %v783_v29, %v650_v42  ;;  %v984_v12 = vadd.f32 %v983_v41, %v982_v62 }
 0x16e   :  { %786 = vst.msk [vmem:[#allocation2] sm:$0x1] %vm647_vm1, %v784_v56  ;;  %v985_v35 = vadd.f32 %v984_v12, %v787_v38 }
 0x170   :  { %986 = vst.msk [vmem:[#allocation4] sm:$0x1] %vm647_vm1, %v985_v35 }
 0x175   :  { %v1054_v21 = vld [vmem:[#allocation2] sm:$0x1] }
 0x176   :  { %v1055_v19 = vmul.f32 0.001953125, %v1054_v21 }
 0x177   :  { %v1056_v22 = vld [vmem:[#allocation4] sm:$0x1] }
 0x178   :  { %v1058_v9 = vmul.f32 %v1055_v19, %v1055_v19  ;;  %1061 = vst.msk [vmem:[#allocation2] sm:$0x1] %vm647_vm1, %v1055_v19  ;;  %v1057_v0 = vmul.f32 0.001953125, %v1056_v22 }
 0x179   :  { %1319 = shalt.err (!%p1316_p4)
}
 0x17a   :  { %s1320_s10 = scalar_lea.hbm %s2049_s3, 16 }
 0x17b   :  { %p1321_p5 = scmp.ne.s32.totalorder %s2049_s3, %s1320_s10  ;;  %p1324_p6 = scmp.lt.u32.totalorder %s1320_s10, %s2049_s3 }
 0x17d   :  { %p1326_p7 = pnand %p1324_p6, %p1321_p5 }
 0x17f   :  { %1329 = shalt.err (!%p1326_p7)
}
 0x180   :  { %1076 = dma.vmem_to_hbm [thread:$0]  %s1074_s5, 16, %s2049_s3, [#allocation3]   ;;  %v1059_v24 = vsub.f32 %v1057_v0, %v1058_v9 }
 0x181   :  { %s1358_s17 = smov [#allocation4]  }
 0x182   :  { %v1060_v26 = vmax.f32 %v1059_v24, 0.0  ;;  %s1083_s18 = sshll.u32 %s1358_s17, 4  ;;  %s1084_s18 = int_to_ptr.vmem [resolvable:$true] %s1083_s18 }
 0x183   :  { %s1330_s19 = scalar_lea.vmem %s1084_s18, 16  ;;  %s1334_s20 = scalar_lea.vmem %s1084_s18, 32 }
 0x184   :  { %v1062_v39 = vadd.f32 1e-05, %v1060_v26  ;;  %p1331_p8 = scmp.ne.s32.totalorder %s1084_s18, %s1330_s19  ;;  %p1335_p9 = scmp.lt.s32.totalorder %s1084_s18, %s1084_s18 }
 0x185   :  { %p1336_p10 = scmp.lt.s32.totalorder %s1334_s20, %s1330_s19 }
 0x186   :  { %1306 = vrsqrt.f32 %v1062_v39 }
 0x187   :  { %p1337_p11 = por %p1336_p10, %p1335_p9 }
 0x189   :  { %p1338_p12 = pnand %p1337_p11, %p1331_p8 }
 0x190   :  { %v1307_v51 = vpop.eup %1306 }
 0x191   :  { %1064 = vst.msk [vmem:[#allocation4] sm:$0x1] %vm647_vm1, %v1307_v51 }
 0x192   :  { %1341 = shalt.err (!%p1338_p12)
}
 0x193   :  { %s1342_s22 = scalar_lea.hbm %s2050_s4, 16 }
 0x194   :  { %p1343_p13 = scmp.ne.s32.totalorder %s2050_s4, %s1342_s22  ;;  %p1346_p0 = scmp.lt.u32.totalorder %s1342_s22, %s2050_s4 }
 0x196   :  { %p1348_p1 = pnand %p1346_p0, %p1343_p13 }
 0x198   :  { %1351 = shalt.err (!%p1348_p1)
}
 0x199   :  { %1086 = dma.vmem_to_hbm [thread:$0]  %s1084_s18, 16, %s2050_s4, [#allocation5]  }
 0x19a   :  { %1352 = dma.done.wait [#allocation3], 16  }
 0x19b   :  { %1353 = vsyncadd [#allocation3], 4294967280 }
 0x19c   :  { %1354 = dma.done.wait [#allocation5], 16  }
 0x19d   :  { %1355 = vsyncadd [#allocation5], 4294967280 }
 0x19e   :  { %1095 = vsyncpa [#allocation3], 1 }
 0x19f   :  { %1096 = vsyncpa [#allocation5], 1 }

</bundles_post_ra>
